<compile_context>
chip_gen: v5e
topology: v5e:2x2
jax: 0.10.0
libtpu: 0.0.40
codegen_flags: <defaults>
</compile_context>

<pallas_src>
import math

import jax
import jax.numpy as jnp
from jax.experimental import pallas as pl
from jax.experimental.pallas import tpu as pltpu


LANE = 128
SUBLANE = 8
# Stay under the smallest scoped-VMEM default across v5e/v6e/v7x (16 MiB on
# v5e) including double-buffered input tiles.
_VMEM_BUDGET = 12 * 1024 * 1024


def _round_up(x: int, m: int) -> int:
    return ((x + m - 1) // m) * m


def _pick_tile(size_padded: int, cap: int, align: int) -> int:
    """Largest multiple of `align`, <= cap, that divides `size_padded`."""
    best = align
    hi = max(align, min(cap, size_padded))
    t = align
    while t <= hi:
        if size_padded % t == 0:
            best = t
        t += align
    return best


def _pad2d(a, rows: int, cols: int, dtype):
    """Zero-pad a 2-D array to (rows, cols) and cast; no-op copy if aligned."""
    a = a.astype(dtype)
    if a.shape == (rows, cols):
        return a
    out = jnp.zeros((rows, cols), dtype)
    return out.at[: a.shape[0], : a.shape[1]].set(a)


# ---------------------------------------------------------------------------
# Kernels
# ---------------------------------------------------------------------------
def _masked_mlp_kernel_single_k(x_ref, w_ref, mask_ref, b_ref, o_ref):
    """Whole K in one tile: one straight-line MXU pass per (i, j) tile.

    x_ref:    [tm, in_p]  bf16 activations
    w_ref:    [in_p, tn]  bf16 weight (pre-transposed to [in, out])
    mask_ref: [1,  tn]    f32 per-output-column mask
    b_ref:    [1,  tn]    f32 bias
    o_ref:    [tm, tn]    f32 output tile
    """
    acc = jnp.dot(x_ref[...], w_ref[...], preferred_element_type=jnp.float32)
    o_ref[...] = (acc * mask_ref[...] + b_ref[...]).astype(o_ref.dtype)


def _masked_mlp_kernel_multi_k(x_ref, w_ref, mask_ref, b_ref, o_ref):
    """K-tiled: accumulate directly into the resident f32 output block."""
    k = pl.program_id(2)

    @pl.when(k == 0)
    def _():
        o_ref[...] = jnp.zeros_like(o_ref)

    o_ref[...] += jnp.dot(x_ref[...], w_ref[...],
                          preferred_element_type=jnp.float32)

    @pl.when(k == pl.num_programs(2) - 1)
    def _():
        o_ref[...] = o_ref[...] * mask_ref[...] + b_ref[...]


# ---------------------------------------------------------------------------
# Wrapper: static (per-weight) prep + per-call apply
# ---------------------------------------------------------------------------
def prepare_masked_mlp(weight, bias, threshold, compute_dtype=jnp.bfloat16):
    """Hoisted static prep: mask/ratio decision + padded/cast/transposed W.

    The mask is computed from the ORIGINAL f32 weights (before the bf16 cast)
    so the BinaryStep / ratio-fallback decision matches the module exactly.
    Call once per weight update; the result is reused for every forward.
    """
    out_size, in_size = weight.shape
    w32 = weight.astype(jnp.float32)

    thr = jnp.maximum(threshold.reshape(()).astype(jnp.float32), 0.0)
    mean_w = jnp.sum(jnp.abs(w32), axis=1) * jnp.float32(1.0 / in_size)   # [out]
    mask1 = (mean_w - thr > 0.0).astype(jnp.float32)
    ratio = jnp.sum(mask1) * jnp.float32(1.0 / out_size)
    mask = jnp.where(ratio <= 0.01, (mean_w > 0.0).astype(jnp.float32), mask1)

    in_p = _round_up(in_size, LANE)
    out_p = _round_up(out_size, LANE)

    # Transpose fused into the padded copy we build anyway -> [in_p, out_p].
    wt_p = _pad2d(w32.T, in_p, out_p, compute_dtype)
    mask_p = _pad2d(mask.reshape(1, out_size), 1, out_p, jnp.float32)
    bias_p = _pad2d(bias.reshape(1, out_size), 1, out_p, jnp.float32)

    return dict(wt=wt_p, mask=mask_p, bias=bias_p,
                in_size=in_size, out_size=out_size,
                compute_dtype=compute_dtype)


def masked_mlp_apply(x, params, *, tm_cap=256, tn_cap=512, tk_cap=2048,
                     vmem_budget=_VMEM_BUDGET):
    """x: [B, in] -> [B, out] using prepared params."""
    wt, mask_p, bias_p = params["wt"], params["mask"], params["bias"]
    in_size, out_size = params["in_size"], params["out_size"]
    cdt = params["compute_dtype"]
    in_p, out_p = wt.shape
    B = x.shape[0]

    # ---- tile selection: minimize padding waste, feed both v7x TensorCores.
    b_p = _round_up(B, SUBLANE)
    tm = _pick_tile(b_p, tm_cap, SUBLANE)
    num_m_blocks = b_p // tm

    tn = _pick_tile(out_p, tn_cap, LANE)
    if num_m_blocks * (out_p // tn) < 2:
        # Expose >= 2 parallel (M, N) blocks when possible (v7x megacore).
        for cand in range(tn - LANE, 0, -LANE):
            if out_p % cand == 0 and out_p // cand >= 2:
                tn = cand
                break
    num_n_blocks = out_p // tn

    x_p = _pad2d(x, b_p, in_p, cdt)

    itemsize = jnp.dtype(cdt).itemsize
    # Single-K fast path: whole reduction axis resident (double-buffered).
    single_k_bytes = 2 * (tm * in_p + in_p * tn) * itemsize + 2 * tm * tn * 4
    single_k = single_k_bytes <= vmem_budget

    cost = pl.CostEstimate(
        flops=2 * B * in_size * out_size,
        transcendentals=0,
        bytes_accessed=((b_p * in_p + in_p * out_p) * itemsize
                        + b_p * out_p * 4 + 2 * out_p * 4),
    )

    if single_k:
        out = pl.pallas_call(
            _masked_mlp_kernel_single_k,
            out_shape=jax.ShapeDtypeStruct((b_p, out_p), jnp.float32),
            grid_spec=pltpu.PrefetchScalarGridSpec(
                num_scalar_prefetch=0,
                grid=(num_m_blocks, num_n_blocks),
                in_specs=[
                    pl.BlockSpec((tm, in_p), lambda i, j: (i, 0)),   # x
                    pl.BlockSpec((in_p, tn), lambda i, j: (0, j)),   # W.T
                    pl.BlockSpec((1, tn), lambda i, j: (0, j)),      # mask row
                    pl.BlockSpec((1, tn), lambda i, j: (0, j)),      # bias row
                ],
                out_specs=pl.BlockSpec((tm, tn), lambda i, j: (i, j)),
            ),
            compiler_params=pltpu.CompilerParams(
                dimension_semantics=("parallel", "parallel")),
            cost_estimate=cost,
        )(x_p, wt, mask_p, bias_p)
    else:
        tk = _pick_tile(in_p, tk_cap, LANE)
        out = pl.pallas_call(
            _masked_mlp_kernel_multi_k,
            out_shape=jax.ShapeDtypeStruct((b_p, out_p), jnp.float32),
            grid_spec=pltpu.PrefetchScalarGridSpec(
                num_scalar_prefetch=0,
                grid=(num_m_blocks, num_n_blocks, in_p // tk),
                in_specs=[
                    pl.BlockSpec((tm, tk), lambda i, j, k: (i, k)),   # x
                    pl.BlockSpec((tk, tn), lambda i, j, k: (k, j)),   # W.T
                    pl.BlockSpec((1, tn), lambda i, j, k: (0, j)),    # mask row
                    pl.BlockSpec((1, tn), lambda i, j, k: (0, j)),    # bias row
                ],
                out_specs=pl.BlockSpec((tm, tn), lambda i, j, k: (i, j)),
            ),
            compiler_params=pltpu.CompilerParams(
                dimension_semantics=("parallel", "parallel", "arbitrary")),
            cost_estimate=cost,
        )(x_p, wt, mask_p, bias_p)

    return out[:B, :out_size]


def masked_mlp(x, weight, bias, threshold, **kwargs):
    """Convenience one-shot wrapper (real models should prepare() once)."""
    return masked_mlp_apply(x, prepare_masked_mlp(weight, bias, threshold),
                            **kwargs)


# ---------------------------------------------------------------------------
# References
# ---------------------------------------------------------------------------
def _mask_ref(weight, threshold):
    thr = jnp.maximum(threshold[0], 0.0)
    mean_w = jnp.sum(jnp.abs(weight), axis=1) / weight.shape[1]
    mask1 = (mean_w - thr > 0.0).astype(jnp.float32)
    ratio = jnp.sum(mask1) / mask1.size
    return jnp.where(ratio <= 0.01, (mean_w > 0.0).astype(jnp.float32), mask1)


def _reference_f32(x, weight, bias, threshold):
    """Pure-f32 reference mirroring the PyTorch forward exactly."""
    mask = _mask_ref(weight, threshold)
    return x @ (weight * mask[:, None]).T + bias[None, :]


def _reference_bf16(x, weight, bias, threshold):
    """Same semantics with bf16 GEMM / f32 accumulation (kernel numerics)."""
    mask = _mask_ref(weight, threshold)
    acc = jnp.dot(x.astype(jnp.bfloat16), weight.T.astype(jnp.bfloat16),
                  preferred_element_type=jnp.float32)
    return acc * mask[None, :] + bias[None, :]


if __name__ == "__main__":
    key = jax.random.PRNGKey(0)

    def make_case(key, batch, in_size, out_size):
        kx, kw, kb = jax.random.split(key, 3)
        # nn.Linear reset_parameters: kaiming_uniform(a=sqrt(5)) on [out, in]
        # -> U(-1/sqrt(fan_in), 1/sqrt(fan_in)); threshold fill_(0).
        bound = 1.0 / math.sqrt(in_size)
        weight = jax.random.uniform(
            kw, (out_size, in_size), minval=-bound, maxval=bound,
            dtype=jnp.float32)
        bias = jax.random.uniform(
            kb, (out_size,), minval=-bound, maxval=bound, dtype=jnp.float32)
        threshold = jnp.zeros((1,), dtype=jnp.float32)
        x = jax.random.normal(kx, (batch, in_size), dtype=jnp.float32)
        return x, weight, bias, threshold

    k1, k2 = jax.random.split(key)

    # Case 1: module-native tiny shape (padding to 128/8, single-K fast path).
    x, w, b, t = make_case(k1, batch=8, in_size=32, out_size=32)
    out = jax.block_until_ready(masked_mlp(x, w, b, t))
    assert out.shape == (8, 32)
    assert jnp.allclose(out, _reference_bf16(x, w, b, t), atol=1e-3, rtol=1e-3)
    assert jnp.allclose(out, _reference_f32(x, w, b, t), atol=5e-2, rtol=5e-2)

    # Case 2: multiple N tiles (out=384 -> tn=128, zero pad waste), single-K.
    x2, w2, b2, t2 = make_case(k2, batch=16, in_size=1024, out_size=384)
    params2 = prepare_masked_mlp(w2, b2, t2)          # hoisted static prep
    out2 = jax.block_until_ready(masked_mlp_apply(x2, params2))
    assert out2.shape == (16, 384)
    assert jnp.allclose(out2, _reference_bf16(x2, w2, b2, t2),
                        atol=1e-3, rtol=1e-3)
    assert jnp.allclose(out2, _reference_f32(x2, w2, b2, t2),
                        atol=5e-2, rtol=5e-2)

    # Case 3: same data, forced K-tiled path (exercises the multi-K kernel).
    out3 = jax.block_until_ready(
        masked_mlp_apply(x2, params2, tk_cap=256, vmem_budget=1))
    assert jnp.allclose(out3, _reference_bf16(x2, w2, b2, t2),
                        atol=1e-3, rtol=1e-3)
    assert jnp.allclose(out3, _reference_f32(x2, w2, b2, t2),
                        atol=5e-2, rtol=5e-2)

    print("KERNEL_OK")
</pallas_src>

<mosaic_0001>
module attributes {stable_mosaic.version = 11 : i64} {
  func.func @_masked_mlp_kernel_single_k(%arg0: i32, %arg1: i32, %arg2: memref<8x128xbf16, #tpu.memory_space<vmem>>, %arg3: memref<128x128xbf16, #tpu.memory_space<vmem>>, %arg4: memref<1x128xf32, #tpu.memory_space<vmem>>, %arg5: memref<1x128xf32, #tpu.memory_space<vmem>>, %arg6: memref<8x128xf32, #tpu.memory_space<vmem>>) attributes {dimension_semantics = [#tpu.dimension_semantics<parallel>, #tpu.dimension_semantics<parallel>], iteration_bounds = array<i64: 1, 1>, scalar_prefetch = 0 : i64, scratch_operands = 0 : i64, tpu.core_type = #tpu.core_type<tc>, window_params = [{transform_indices = @transform_0, window_bounds = array<i64: 8, 128>}, {transform_indices = @transform_1, window_bounds = array<i64: 128, 128>}, {transform_indices = @transform_2, window_bounds = array<i64: 1, 128>}, {transform_indices = @transform_3, window_bounds = array<i64: 1, 128>}, {transform_indices = @transform_4, window_bounds = array<i64: 8, 128>}]} {
    %c0 = arith.constant 0 : index
    %c0_0 = arith.constant 0 : index
    %0 = vector.load %arg2[%c0, %c0_0] : memref<8x128xbf16, #tpu.memory_space<vmem>>, vector<8x128xbf16>
    %c0_1 = arith.constant 0 : index
    %c0_2 = arith.constant 0 : index
    %1 = vector.load %arg3[%c0_1, %c0_2] : memref<128x128xbf16, #tpu.memory_space<vmem>>, vector<128x128xbf16>
    %cst = arith.constant dense<0.000000e+00> : vector<8x128xf32>
    %2 = tpu.matmul %0, %1, %cst {dimension_numbers = #tpu.dot_dimension_numbers<[1], [0], [0], [1], [0, 0, 1, 1], [], []>} : vector<8x128xbf16>, vector<128x128xbf16>, vector<8x128xf32> -> vector<8x128xf32>
    %c0_3 = arith.constant 0 : index
    %c0_4 = arith.constant 0 : index
    %3 = vector.load %arg4[%c0_3, %c0_4] : memref<1x128xf32, #tpu.memory_space<vmem>>, vector<1x128xf32>
    %4 = vector.broadcast %3 : vector<1x128xf32> to vector<8x128xf32>
    %5 = arith.mulf %2, %4 : vector<8x128xf32>
    %c0_5 = arith.constant 0 : index
    %c0_6 = arith.constant 0 : index
    %6 = vector.load %arg5[%c0_5, %c0_6] : memref<1x128xf32, #tpu.memory_space<vmem>>, vector<1x128xf32>
    %7 = vector.broadcast %6 : vector<1x128xf32> to vector<8x128xf32>
    %8 = arith.addf %5, %7 : vector<8x128xf32>
    %c0_7 = arith.constant 0 : index
    %c0_8 = arith.constant 0 : index
    %9 = vector.load %arg6[%c0_7, %c0_8] : memref<8x128xf32, #tpu.memory_space<vmem>>, vector<8x128xf32>
    tpu.vector_store %arg6[%c0_7, %c0_8], %8 {strides = array<i32>} : memref<8x128xf32, #tpu.memory_space<vmem>>, vector<8x128xf32>,
    return
  }
  func.func @transform_0(%arg0: i32, %arg1: i32) -> (i32, i32) {
    %c0_i32 = arith.constant 0 : i32
    %c0_i32_0 = arith.constant 0 : i32
    return %arg0, %c0_i32 : i32, i32
  }
  func.func @transform_1(%arg0: i32, %arg1: i32) -> (i32, i32) {
    %c0_i32 = arith.constant 0 : i32
    %c0_i32_0 = arith.constant 0 : i32
    return %c0_i32, %arg1 : i32, i32
  }
  func.func @transform_2(%arg0: i32, %arg1: i32) -> (i32, i32) {
    %c0_i32 = arith.constant 0 : i32
    %c0_i32_0 = arith.constant 0 : i32
    return %c0_i32, %arg1 : i32, i32
  }
  func.func @transform_3(%arg0: i32, %arg1: i32) -> (i32, i32) {
    %c0_i32 = arith.constant 0 : i32
    %c0_i32_0 = arith.constant 0 : i32
    return %c0_i32, %arg1 : i32, i32
  }
  func.func @transform_4(%arg0: i32, %arg1: i32) -> (i32, i32) {
    %c0_i32 = arith.constant 0 : i32
    return %arg0, %arg1 : i32, i32
  }
}

</mosaic_0001>

<bundles_post_ra>
// kernel: tpu_custom_call.1
= control target key start
LH: loop header
LB: loop body
LE: loop exit
PB: predicated region body
PF: predicated region fallthrough
CT: control target
= control target key end

     0   :  { %9 = vsyncpa [#allocation3], 0  ;;  %s325_s0 = inlined_call_operand.hbm [shape: bf16[8,128], index: 0, kind: input, shape index: {}]   ;;  %s326_s1 = inlined_call_operand.hbm [shape: bf16[128,128], index: 1, kind: input, shape index: {}]   ;;  %s327_s2 = inlined_call_operand.vmem [shape: f32[1,128], index: 2, kind: input, shape index: {}]   ;;  %s328_s3 = inlined_call_operand.vmem [shape: f32[1,128], index: 3, kind: input, shape index: {}]   ;;  %s329_s4 = inlined_call_operand.hbm [shape: f32[8,128], index: 4, kind: output, shape index: {}]  }
   0x1   :  { %10 = vsyncpa [#allocation6], 0 }
   0x2   :  { %11 = vsyncpa [#allocation4], 0  ;;  %s17_s17 = sshll.u32 %s325_s0, 4  ;;  %s280_s18 = smov [#allocation2]   ;;  %s18_s17 = int_to_ptr.hbm [resolvable:$true] %s17_s17 }
   0x3   :  { %s19_s19 = sshll.u32 %s280_s18, 4  ;;  %s27_s22 = sshll.u32 %s326_s1, 4  ;;  %s20_s19 = int_to_ptr.vmem [resolvable:$true] %s19_s19  ;;  %s28_s22 = int_to_ptr.hbm [resolvable:$true] %s27_s22 }
   0x4   :  { %22 = dma.hbm_to_vmem [thread:$0]  %s18_s17, 64, %s20_s19, [#allocation3]  }
   0x5   :  { %s281_s23 = smov [#allocation5]   ;;  %s282_s25 = smov 64  }
   0x6   :  { %s29_s24 = sshll.u32 %s281_s23, 4  ;;  %s283_s26 = smov 4   ;;  %s30_s24 = int_to_ptr.vmem [resolvable:$true] %s29_s24 }
   0x7   :  { %35 = dma.hbm_to_vmem [thread:$0]  %s28_s22, 1024, %s30_s24, [#allocation6], %s282_s25, %s282_s25, %s283_s26  }
   0x8   :  { %274 = dma.done.wait [#allocation3], 64  }
   0x9   :  { %275 = vsyncadd [#allocation3], 4294967232 }
   0xa   :  { %276 = dma.done.wait [#allocation6], 1024  }
   0xb   :  { %277 = vsyncadd [#allocation6], 4294966272  ;;  %v194_v0 = vld [vmem:[#allocation5 + $0x38] sm:$0xff]  ;;  %v193_v1 = vld [vmem:[#allocation5 + $0x30] sm:$0xff]  ;;  %s284_s29 = smov [#allocation7]   ;;  %s144_s7 = sshll.u32 %s329_s4, 4  ;;  %s145_s7 = int_to_ptr.hbm [resolvable:$true] %s144_s7 }
   0xc   :  { %113 = vmatpush.bf16.msra.mxu0 %v194_v0  ;;  %v192_v2 = vld [vmem:[#allocation5 + $0x28] sm:$0xff]  ;;  %v191_v3 = vld [vmem:[#allocation5 + $0x20] sm:$0xff]  ;;  %v190_v4 = vld [vmem:[#allocation5 + $0x18] sm:$0xff]  ;;  %s142_s30 = sshll.u32 %s284_s29, 4  ;;  %s143_s30 = int_to_ptr.vmem [resolvable:$true] %s142_s30 }
   0xd   :  { %v189_v5 = vld [vmem:[#allocation5 + $0x10] sm:$0xff]  ;;  %v188_v6 = vld [vmem:[#allocation5 + $0x8] sm:$0xff]  ;;  %v187_v7 = vld [vmem:[#allocation5] sm:$0xff] }
   0xe   :  { %v48_v8 = vld [vmem:[#allocation2] sm:$0xf] }
   0xf   :  { %v200_v9 = vld [vmem:[%s327_s2] ss:$0 sm:$0xff] }
  0x10   :  { %114 = vmatpush.bf16.msra.mxu0 %v193_v1  ;;  %v201_v10 = vld [vmem:[%s328_s3] ss:$0 sm:$0xff] }
  0x14   :  { %115 = vmatpush.bf16.msra.mxu0 %v192_v2 }
  0x18   :  { %116 = vmatpush.bf16.msra.mxu0 %v191_v3 }
  0x1c   :  { %117 = vmatpush.bf16.msra.mxu0 %v190_v4 }
  0x20   :  { %118 = vmatpush.bf16.msra.mxu0 %v189_v5 }
  0x24   :  { %119 = vmatpush.bf16.msra.mxu0 %v188_v6 }
  0x28   :  { %120 = vmatpush.bf16.msra.mxu0 %v187_v7 }
  0x2b   :  { %121 = vmatmul.bf16.vlgmr.msra.gmra.mxu0 %v48_v8 }
  0xa8   :  { %v122_v11 = vpop.f32.mrf.mxu0 }
  0xa9   :  { %v130_v12 = vmul.f32 %v200_v9, %v122_v11 }
  0xab   :  { %v135_v13 = vadd.f32 %v201_v10, %v130_v12 }
  0xad   :  { %136 = vst [vmem:[#allocation7] sm:$0xff] %v135_v13 }
  0xae   :  { %147 = dma.vmem_to_hbm [thread:$0]  %s143_s30, 128, %s145_s7, [#allocation4]  }
  0xb0   :  { %v124_v14 = vpop.f32.mrf.mxu0 }
  0xb1   :  { %278 = dma.done.wait [#allocation4], 128  }
  0xb2   :  { %279 = vsyncadd [#allocation4], 4294967168 }
  0xb3   :  { %152 = vsyncpa [#allocation3], 1 }
  0xb4   :  { %153 = vsyncpa [#allocation6], 1 }
  0xb5   :  { %154 = vsyncpa [#allocation4], 1 }

</bundles_post_ra>
